<compile_context>
chip_gen: v5e
topology: v5e:2x2
jax: 0.10.0
libtpu: 0.0.40
codegen_flags: <defaults>
</compile_context>

<pallas_src>
import jax
import jax.numpy as jnp
import numpy as np
from jax import lax
from jax.experimental import pallas as pl
from jax.experimental.pallas import tpu as pltpu


# ------------------------------------------------------------------
# Fused forward: Conv2d(3x3, pad=1) + bias + ReLU + MaxPool2d(2), NCHW in/out
# ------------------------------------------------------------------
def intermediate_model_forward(x_nchw, conv_w, conv_b):
    """x_nchw: (N, Cin, H, W) f32; conv_w: (Cout, Cin, 3, 3); conv_b: (Cout,).
    Returns (N, Cout, H//2, W//2) f32."""
    N, Cin, H, W = x_nchw.shape
    Cout = conv_w.shape[0]
    Hp, Wp = H + 2, W + 2              # zero-padded spatial dims
    P = Hp * Wp                        # flattened padded pixel count
    PA = P + Wp + 1                    # conv-accumulator width (covers pool offsets)
    XW = PA + 2 * Wp + 2               # input slab width (covers all 9 tap offsets)
    Ho, Wo = H // 2, W // 2
    M2 = Ho * Wo

    # ---- XLA glue: cheap layout prep (no 9x im2col blow-up) ----
    xp = jnp.pad(x_nchw, ((0, 0), (0, 0), (1, 1), (1, 1)))            # (N,Cin,Hp,Wp)
    xflat = xp.reshape(N, Cin, P)
    xw = jnp.pad(xflat, ((0, 0), (0, 0), (Wp + 1, XW - P - (Wp + 1))))  # (N,Cin,XW)

    # Per-tap (Cout, Cin) weight matrices; tap index t = kh*3 + kw.
    w9 = jnp.transpose(conv_w, (2, 3, 0, 1)).reshape(9, Cout, Cin)
    b2 = conv_b.reshape(Cout, 1)

    # One-hot pool-window selection matrices (compile-time constants).
    # sel[d, q, m] = 1 iff padded-flat position q is element d of pool window m.
    m_idx = np.arange(M2)
    base = (2 * (m_idx // Wo) + 1) * Wp + (2 * (m_idx % Wo) + 1)       # (M2,)
    offs = np.array([0, 1, Wp, Wp + 1])                                # (4,) = 2x2 window
    q_idx = np.arange(PA)
    sel_np = (q_idx[None, :, None] ==
              (base[None, None, :] + offs[:, None, None])).astype(np.float32)
    sel = jnp.asarray(sel_np)                                          # (4, PA, M2)

    # ---- fused Pallas kernel: one image per grid step ----
    def kernel(x_ref, w_ref, b_ref, s_ref, o_ref):
        # x_ref: (1, Cin, XW)   padded + flattened image
        # w_ref: (9, Cout, Cin) per-tap weights
        # b_ref: (Cout, 1)      bias
        # s_ref: (4, PA, M2)    one-hot pool-window selectors
        # o_ref: (1, Cout, M2)  pooled output tile
        acc = jnp.zeros((Cout, PA), jnp.float32)
        for kh in range(3):
            for kw in range(3):
                off = kh * Wp + kw                       # static lane shift per tap
                tap = x_ref[0, :, off:off + PA]          # (Cin, PA)
                acc = acc + jnp.dot(w_ref[kh * 3 + kw], tap,
                                    preferred_element_type=jnp.float32)
        acc = jnp.maximum(acc + b_ref[...], 0.0)         # bias + ReLU (f32 epilogue)
        # 2x2 max-pool: gather each of the 4 window elements (one-hot matmuls) + max.
        p00 = jnp.dot(acc, s_ref[0], preferred_element_type=jnp.float32)
        p01 = jnp.dot(acc, s_ref[1], preferred_element_type=jnp.float32)
        p10 = jnp.dot(acc, s_ref[2], preferred_element_type=jnp.float32)
        p11 = jnp.dot(acc, s_ref[3], preferred_element_type=jnp.float32)
        o_ref[0] = jnp.maximum(jnp.maximum(p00, p01), jnp.maximum(p10, p11))

    out = pl.pallas_call(
        kernel,
        out_shape=jax.ShapeDtypeStruct((N, Cout, M2), jnp.float32),
        grid=(N,),
        in_specs=[
            pl.BlockSpec((1, Cin, XW), lambda n: (n, 0, 0)),
            pl.BlockSpec((9, Cout, Cin), lambda n: (0, 0, 0)),
            pl.BlockSpec((Cout, 1), lambda n: (0, 0)),
            pl.BlockSpec((4, PA, M2), lambda n: (0, 0, 0)),
        ],
        out_specs=pl.BlockSpec((1, Cout, M2), lambda n: (n, 0, 0)),
        compiler_params=pltpu.CompilerParams(
            dimension_semantics=("parallel",)),
    )(xw, w9, b2, sel)

    # Pure reshape (no transpose): kernel already emits channel-major per image.
    return out.reshape(N, Cout, Ho, Wo)


# ------------------------------------------------------------------
# Pure-JAX reference for correctness check
# ------------------------------------------------------------------
def reference_forward(x_nchw, conv_w, conv_b):
    y = lax.conv_general_dilated(
        x_nchw, conv_w, window_strides=(1, 1), padding=((1, 1), (1, 1)),
        dimension_numbers=("NCHW", "OIHW", "NCHW"))
    y = y + conv_b.reshape(1, -1, 1, 1)
    y = jnp.maximum(y, 0.0)
    y = lax.reduce_window(y, -jnp.inf, lax.max,
                          window_dimensions=(1, 1, 2, 2),
                          window_strides=(1, 1, 2, 2), padding="VALID")
    return y


if __name__ == "__main__":
    key = jax.random.PRNGKey(0)
    k_x, k_w, k_b = jax.random.split(key, 3)

    N, Cin, H, W = 2, 4, 16, 16
    Cout = 8

    x = jax.random.normal(k_x, (N, Cin, H, W), dtype=jnp.float32)
    conv_w = jax.random.normal(k_w, (Cout, Cin, 3, 3), dtype=jnp.float32) * 0.1
    conv_b = jax.random.normal(k_b, (Cout,), dtype=jnp.float32) * 0.1

    out = jax.jit(intermediate_model_forward)(x, conv_w, conv_b)
    out = jax.block_until_ready(out)

    ref = reference_forward(x, conv_w, conv_b)
    assert out.shape == (N, Cout, H // 2, W // 2), out.shape
    np.testing.assert_allclose(np.asarray(out), np.asarray(ref),
                               rtol=1e-4, atol=1e-4)
    print("KERNEL_OK")
</pallas_src>

<mosaic_0001>
module attributes {stable_mosaic.version = 11 : i64} {
  func.func @kernel(%arg0: i32, %arg1: memref<1x4x381xf32, #tpu.memory_space<vmem>>, %arg2: memref<9x8x4xf32, #tpu.memory_space<vmem>>, %arg3: memref<8x1xf32, #tpu.memory_space<vmem>>, %arg4: memref<4x343x64xf32, #tpu.memory_space<vmem>>, %arg5: memref<1x8x64xf32, #tpu.memory_space<vmem>>) attributes {dimension_semantics = [#tpu.dimension_semantics<parallel>], iteration_bounds = array<i64: 2>, scalar_prefetch = 0 : i64, scratch_operands = 0 : i64, tpu.core_type = #tpu.core_type<tc>, window_params = [{transform_indices = @transform_0, window_bounds = array<i64: 1, 4, 381>}, {pipeline_mode = #tpu.pipeline_mode<synchronous>, transform_indices = @transform_1, window_bounds = array<i64: 9, 8, 4>}, {pipeline_mode = #tpu.pipeline_mode<synchronous>, transform_indices = @transform_2, window_bounds = array<i64: 8, 1>}, {pipeline_mode = #tpu.pipeline_mode<synchronous>, transform_indices = @transform_3, window_bounds = array<i64: 4, 343, 64>}, {transform_indices = @transform_4, window_bounds = array<i64: 1, 8, 64>}]} {
    %cst = arith.constant 0.000000e+00 : f32
    %0 = vector.broadcast %cst : f32 to vector<8x343xf32>
    %c0 = arith.constant 0 : index
    %c0_0 = arith.constant 0 : index
    %c0_1 = arith.constant 0 : index
    %1 = vector.load %arg1[%c0, %c0_0, %c0_1] : memref<1x4x381xf32, #tpu.memory_space<vmem>>, vector<1x4x343xf32>
    %2 = vector.shape_cast %1 : vector<1x4x343xf32> to vector<4x343xf32>
    %c0_2 = arith.constant 0 : index
    %c0_3 = arith.constant 0 : index
    %c0_4 = arith.constant 0 : index
    %3 = vector.load %arg2[%c0_2, %c0_3, %c0_4] : memref<9x8x4xf32, #tpu.memory_space<vmem>>, vector<1x8x4xf32>
    %4 = vector.shape_cast %3 : vector<1x8x4xf32> to vector<8x4xf32>
    %cst_5 = arith.constant dense<0.000000e+00> : vector<8x343xf32>
    %5 = tpu.matmul %4, %2, %cst_5 {dimension_numbers = #tpu.dot_dimension_numbers<[1], [0], [0], [1], [0, 0, 1, 1], [], []>} : vector<8x4xf32>, vector<4x343xf32>, vector<8x343xf32> -> vector<8x343xf32>
    %6 = arith.addf %0, %5 : vector<8x343xf32>
    %c0_6 = arith.constant 0 : index
    %c0_7 = arith.constant 0 : index
    %c1 = arith.constant 1 : index
    %7 = vector.load %arg1[%c0_6, %c0_7, %c1] : memref<1x4x381xf32, #tpu.memory_space<vmem>>, vector<1x4x343xf32>
    %8 = vector.shape_cast %7 : vector<1x4x343xf32> to vector<4x343xf32>
    %c1_8 = arith.constant 1 : index
    %c0_9 = arith.constant 0 : index
    %c0_10 = arith.constant 0 : index
    %9 = vector.load %arg2[%c1_8, %c0_9, %c0_10] : memref<9x8x4xf32, #tpu.memory_space<vmem>>, vector<1x8x4xf32>
    %10 = vector.shape_cast %9 : vector<1x8x4xf32> to vector<8x4xf32>
    %cst_11 = arith.constant dense<0.000000e+00> : vector<8x343xf32>
    %11 = tpu.matmul %10, %8, %cst_11 {dimension_numbers = #tpu.dot_dimension_numbers<[1], [0], [0], [1], [0, 0, 1, 1], [], []>} : vector<8x4xf32>, vector<4x343xf32>, vector<8x343xf32> -> vector<8x343xf32>
    %12 = arith.addf %6, %11 : vector<8x343xf32>
    %c0_12 = arith.constant 0 : index
    %c0_13 = arith.constant 0 : index
    %c2 = arith.constant 2 : index
    %13 = vector.load %arg1[%c0_12, %c0_13, %c2] : memref<1x4x381xf32, #tpu.memory_space<vmem>>, vector<1x4x343xf32>
    %14 = vector.shape_cast %13 : vector<1x4x343xf32> to vector<4x343xf32>
    %c2_14 = arith.constant 2 : index
    %c0_15 = arith.constant 0 : index
    %c0_16 = arith.constant 0 : index
    %15 = vector.load %arg2[%c2_14, %c0_15, %c0_16] : memref<9x8x4xf32, #tpu.memory_space<vmem>>, vector<1x8x4xf32>
    %16 = vector.shape_cast %15 : vector<1x8x4xf32> to vector<8x4xf32>
    %cst_17 = arith.constant dense<0.000000e+00> : vector<8x343xf32>
    %17 = tpu.matmul %16, %14, %cst_17 {dimension_numbers = #tpu.dot_dimension_numbers<[1], [0], [0], [1], [0, 0, 1, 1], [], []>} : vector<8x4xf32>, vector<4x343xf32>, vector<8x343xf32> -> vector<8x343xf32>
    %18 = arith.addf %12, %17 : vector<8x343xf32>
    %c0_18 = arith.constant 0 : index
    %c0_19 = arith.constant 0 : index
    %c18 = arith.constant 18 : index
    %19 = vector.load %arg1[%c0_18, %c0_19, %c18] : memref<1x4x381xf32, #tpu.memory_space<vmem>>, vector<1x4x343xf32>
    %20 = vector.shape_cast %19 : vector<1x4x343xf32> to vector<4x343xf32>
    %c3 = arith.constant 3 : index
    %c0_20 = arith.constant 0 : index
    %c0_21 = arith.constant 0 : index
    %21 = vector.load %arg2[%c3, %c0_20, %c0_21] : memref<9x8x4xf32, #tpu.memory_space<vmem>>, vector<1x8x4xf32>
    %22 = vector.shape_cast %21 : vector<1x8x4xf32> to vector<8x4xf32>
    %cst_22 = arith.constant dense<0.000000e+00> : vector<8x343xf32>
    %23 = tpu.matmul %22, %20, %cst_22 {dimension_numbers = #tpu.dot_dimension_numbers<[1], [0], [0], [1], [0, 0, 1, 1], [], []>} : vector<8x4xf32>, vector<4x343xf32>, vector<8x343xf32> -> vector<8x343xf32>
    %24 = arith.addf %18, %23 : vector<8x343xf32>
    %c0_23 = arith.constant 0 : index
    %c0_24 = arith.constant 0 : index
    %c19 = arith.constant 19 : index
    %25 = vector.load %arg1[%c0_23, %c0_24, %c19] : memref<1x4x381xf32, #tpu.memory_space<vmem>>, vector<1x4x343xf32>
    %26 = vector.shape_cast %25 : vector<1x4x343xf32> to vector<4x343xf32>
    %c4 = arith.constant 4 : index
    %c0_25 = arith.constant 0 : index
    %c0_26 = arith.constant 0 : index
    %27 = vector.load %arg2[%c4, %c0_25, %c0_26] : memref<9x8x4xf32, #tpu.memory_space<vmem>>, vector<1x8x4xf32>
    %28 = vector.shape_cast %27 : vector<1x8x4xf32> to vector<8x4xf32>
    %cst_27 = arith.constant dense<0.000000e+00> : vector<8x343xf32>
    %29 = tpu.matmul %28, %26, %cst_27 {dimension_numbers = #tpu.dot_dimension_numbers<[1], [0], [0], [1], [0, 0, 1, 1], [], []>} : vector<8x4xf32>, vector<4x343xf32>, vector<8x343xf32> -> vector<8x343xf32>
    %30 = arith.addf %24, %29 : vector<8x343xf32>
    %c0_28 = arith.constant 0 : index
    %c0_29 = arith.constant 0 : index
    %c20 = arith.constant 20 : index
    %31 = vector.load %arg1[%c0_28, %c0_29, %c20] : memref<1x4x381xf32, #tpu.memory_space<vmem>>, vector<1x4x343xf32>
    %32 = vector.shape_cast %31 : vector<1x4x343xf32> to vector<4x343xf32>
    %c5 = arith.constant 5 : index
    %c0_30 = arith.constant 0 : index
    %c0_31 = arith.constant 0 : index
    %33 = vector.load %arg2[%c5, %c0_30, %c0_31] : memref<9x8x4xf32, #tpu.memory_space<vmem>>, vector<1x8x4xf32>
    %34 = vector.shape_cast %33 : vector<1x8x4xf32> to vector<8x4xf32>
    %cst_32 = arith.constant dense<0.000000e+00> : vector<8x343xf32>
    %35 = tpu.matmul %34, %32, %cst_32 {dimension_numbers = #tpu.dot_dimension_numbers<[1], [0], [0], [1], [0, 0, 1, 1], [], []>} : vector<8x4xf32>, vector<4x343xf32>, vector<8x343xf32> -> vector<8x343xf32>
    %36 = arith.addf %30, %35 : vector<8x343xf32>
    %c0_33 = arith.constant 0 : index
    %c0_34 = arith.constant 0 : index
    %c36 = arith.constant 36 : index
    %37 = vector.load %arg1[%c0_33, %c0_34, %c36] : memref<1x4x381xf32, #tpu.memory_space<vmem>>, vector<1x4x343xf32>
    %38 = vector.shape_cast %37 : vector<1x4x343xf32> to vector<4x343xf32>
    %c6 = arith.constant 6 : index
    %c0_35 = arith.constant 0 : index
    %c0_36 = arith.constant 0 : index
    %39 = vector.load %arg2[%c6, %c0_35, %c0_36] : memref<9x8x4xf32, #tpu.memory_space<vmem>>, vector<1x8x4xf32>
    %40 = vector.shape_cast %39 : vector<1x8x4xf32> to vector<8x4xf32>
    %cst_37 = arith.constant dense<0.000000e+00> : vector<8x343xf32>
    %41 = tpu.matmul %40, %38, %cst_37 {dimension_numbers = #tpu.dot_dimension_numbers<[1], [0], [0], [1], [0, 0, 1, 1], [], []>} : vector<8x4xf32>, vector<4x343xf32>, vector<8x343xf32> -> vector<8x343xf32>
    %42 = arith.addf %36, %41 : vector<8x343xf32>
    %c0_38 = arith.constant 0 : index
    %c0_39 = arith.constant 0 : index
    %c37 = arith.constant 37 : index
    %43 = vector.load %arg1[%c0_38, %c0_39, %c37] : memref<1x4x381xf32, #tpu.memory_space<vmem>>, vector<1x4x343xf32>
    %44 = vector.shape_cast %43 : vector<1x4x343xf32> to vector<4x343xf32>
    %c7 = arith.constant 7 : index
    %c0_40 = arith.constant 0 : index
    %c0_41 = arith.constant 0 : index
    %45 = vector.load %arg2[%c7, %c0_40, %c0_41] : memref<9x8x4xf32, #tpu.memory_space<vmem>>, vector<1x8x4xf32>
    %46 = vector.shape_cast %45 : vector<1x8x4xf32> to vector<8x4xf32>
    %cst_42 = arith.constant dense<0.000000e+00> : vector<8x343xf32>
    %47 = tpu.matmul %46, %44, %cst_42 {dimension_numbers = #tpu.dot_dimension_numbers<[1], [0], [0], [1], [0, 0, 1, 1], [], []>} : vector<8x4xf32>, vector<4x343xf32>, vector<8x343xf32> -> vector<8x343xf32>
    %48 = arith.addf %42, %47 : vector<8x343xf32>
    %c0_43 = arith.constant 0 : index
    %c0_44 = arith.constant 0 : index
    %c38 = arith.constant 38 : index
    %49 = vector.load %arg1[%c0_43, %c0_44, %c38] : memref<1x4x381xf32, #tpu.memory_space<vmem>>, vector<1x4x343xf32>
    %50 = vector.shape_cast %49 : vector<1x4x343xf32> to vector<4x343xf32>
    %c8 = arith.constant 8 : index
    %c0_45 = arith.constant 0 : index
    %c0_46 = arith.constant 0 : index
    %51 = vector.load %arg2[%c8, %c0_45, %c0_46] : memref<9x8x4xf32, #tpu.memory_space<vmem>>, vector<1x8x4xf32>
    %52 = vector.shape_cast %51 : vector<1x8x4xf32> to vector<8x4xf32>
    %cst_47 = arith.constant dense<0.000000e+00> : vector<8x343xf32>
    %53 = tpu.matmul %52, %50, %cst_47 {dimension_numbers = #tpu.dot_dimension_numbers<[1], [0], [0], [1], [0, 0, 1, 1], [], []>} : vector<8x4xf32>, vector<4x343xf32>, vector<8x343xf32> -> vector<8x343xf32>
    %54 = arith.addf %48, %53 : vector<8x343xf32>
    %c0_48 = arith.constant 0 : index
    %c0_49 = arith.constant 0 : index
    %55 = vector.load %arg3[%c0_48, %c0_49] : memref<8x1xf32, #tpu.memory_space<vmem>>, vector<8x1xf32>
    %56 = vector.broadcast %55 : vector<8x1xf32> to vector<8x343xf32>
    %57 = arith.addf %54, %56 : vector<8x343xf32>
    %cst_50 = arith.constant 0.000000e+00 : f32
    %58 = vector.broadcast %cst_50 : f32 to vector<8x343xf32>
    %59 = arith.maximumf %57, %58 : vector<8x343xf32>
    %c0_51 = arith.constant 0 : index
    %c0_52 = arith.constant 0 : index
    %c0_53 = arith.constant 0 : index
    %60 = vector.load %arg4[%c0_51, %c0_52, %c0_53] : memref<4x343x64xf32, #tpu.memory_space<vmem>>, vector<1x343x64xf32>
    %61 = vector.shape_cast %60 : vector<1x343x64xf32> to vector<343x64xf32>
    %cst_54 = arith.constant dense<0.000000e+00> : vector<8x64xf32>
    %62 = tpu.matmul %59, %61, %cst_54 {dimension_numbers = #tpu.dot_dimension_numbers<[1], [0], [0], [1], [0, 0, 1, 1], [], []>} : vector<8x343xf32>, vector<343x64xf32>, vector<8x64xf32> -> vector<8x64xf32>
    %c1_55 = arith.constant 1 : index
    %c0_56 = arith.constant 0 : index
    %c0_57 = arith.constant 0 : index
    %63 = vector.load %arg4[%c1_55, %c0_56, %c0_57] : memref<4x343x64xf32, #tpu.memory_space<vmem>>, vector<1x343x64xf32>
    %64 = vector.shape_cast %63 : vector<1x343x64xf32> to vector<343x64xf32>
    %cst_58 = arith.constant dense<0.000000e+00> : vector<8x64xf32>
    %65 = tpu.matmul %59, %64, %cst_58 {dimension_numbers = #tpu.dot_dimension_numbers<[1], [0], [0], [1], [0, 0, 1, 1], [], []>} : vector<8x343xf32>, vector<343x64xf32>, vector<8x64xf32> -> vector<8x64xf32>
    %c2_59 = arith.constant 2 : index
    %c0_60 = arith.constant 0 : index
    %c0_61 = arith.constant 0 : index
    %66 = vector.load %arg4[%c2_59, %c0_60, %c0_61] : memref<4x343x64xf32, #tpu.memory_space<vmem>>, vector<1x343x64xf32>
    %67 = vector.shape_cast %66 : vector<1x343x64xf32> to vector<343x64xf32>
    %cst_62 = arith.constant dense<0.000000e+00> : vector<8x64xf32>
    %68 = tpu.matmul %59, %67, %cst_62 {dimension_numbers = #tpu.dot_dimension_numbers<[1], [0], [0], [1], [0, 0, 1, 1], [], []>} : vector<8x343xf32>, vector<343x64xf32>, vector<8x64xf32> -> vector<8x64xf32>
    %c3_63 = arith.constant 3 : index
    %c0_64 = arith.constant 0 : index
    %c0_65 = arith.constant 0 : index
    %69 = vector.load %arg4[%c3_63, %c0_64, %c0_65] : memref<4x343x64xf32, #tpu.memory_space<vmem>>, vector<1x343x64xf32>
    %70 = vector.shape_cast %69 : vector<1x343x64xf32> to vector<343x64xf32>
    %cst_66 = arith.constant dense<0.000000e+00> : vector<8x64xf32>
    %71 = tpu.matmul %59, %70, %cst_66 {dimension_numbers = #tpu.dot_dimension_numbers<[1], [0], [0], [1], [0, 0, 1, 1], [], []>} : vector<8x343xf32>, vector<343x64xf32>, vector<8x64xf32> -> vector<8x64xf32>
    %72 = arith.maximumf %62, %65 : vector<8x64xf32>
    %73 = arith.maximumf %68, %71 : vector<8x64xf32>
    %74 = arith.maximumf %72, %73 : vector<8x64xf32>
    %c0_67 = arith.constant 0 : index
    %c0_68 = arith.constant 0 : index
    %c0_69 = arith.constant 0 : index
    %75 = vector.load %arg5[%c0_67, %c0_68, %c0_69] : memref<1x8x64xf32, #tpu.memory_space<vmem>>, vector<1x8x64xf32>
    %76 = vector.shape_cast %75 : vector<1x8x64xf32> to vector<8x64xf32>
    %77 = vector.shape_cast %74 : vector<8x64xf32> to vector<1x8x64xf32>
    tpu.vector_store %arg5[%c0_67, %c0_68, %c0_69], %77 {strides = array<i32>} : memref<1x8x64xf32, #tpu.memory_space<vmem>>, vector<1x8x64xf32>,
    return
  }
  func.func @transform_0(%arg0: i32) -> (i32, i32, i32) {
    %c0_i32 = arith.constant 0 : i32
    %c0_i32_0 = arith.constant 0 : i32
    %c0_i32_1 = arith.constant 0 : i32
    return %arg0, %c0_i32, %c0_i32_0 : i32, i32, i32
  }
  func.func @transform_1(%arg0: i32) -> (i32, i32, i32) {
    %c0_i32 = arith.constant 0 : i32
    %c0_i32_0 = arith.constant 0 : i32
    %c0_i32_1 = arith.constant 0 : i32
    %c0_i32_2 = arith.constant 0 : i32
    return %c0_i32, %c0_i32_0, %c0_i32_1 : i32, i32, i32
  }
  func.func @transform_2(%arg0: i32) -> (i32, i32) {
    %c0_i32 = arith.constant 0 : i32
    %c0_i32_0 = arith.constant 0 : i32
    %c0_i32_1 = arith.constant 0 : i32
    return %c0_i32, %c0_i32_0 : i32, i32
  }
  func.func @transform_3(%arg0: i32) -> (i32, i32, i32) {
    %c0_i32 = arith.constant 0 : i32
    %c0_i32_0 = arith.constant 0 : i32
    %c0_i32_1 = arith.constant 0 : i32
    %c0_i32_2 = arith.constant 0 : i32
    return %c0_i32, %c0_i32_0, %c0_i32_1 : i32, i32, i32
  }
  func.func @transform_4(%arg0: i32) -> (i32, i32, i32) {
    %c0_i32 = arith.constant 0 : i32
    %c0_i32_0 = arith.constant 0 : i32
    %c0_i32_1 = arith.constant 0 : i32
    return %arg0, %c0_i32, %c0_i32_0 : i32, i32, i32
  }
}

</mosaic_0001>

<bundles_post_ra>
// kernel: intermediate_model_forward.1
= control target key start
LH: loop header
LB: loop body
LE: loop exit
PB: predicated region body
PF: predicated region fallthrough
CT: control target
= control target key end

     0   :  { %9 = vsyncpa [#allocation3], 0  ;;  %s1738_s15 = smov 0   ;;  %s1933_s0 = inlined_call_operand.vmem [shape: f32[2,4,381], index: 0, kind: input, shape index: {}]   ;;  %s1934_s1 = inlined_call_operand.vmem [shape: f32[9,8,4], index: 1, kind: input, shape index: {}]   ;;  %s1935_s2 = inlined_call_operand.vmem [shape: f32[8,1], index: 2, kind: input, shape index: {}]   ;;  %s1936_s3 = inlined_call_operand.hbm [shape: f32[4,343,64], index: 3, kind: input, shape index: {}]   ;;  %s1937_s4 = inlined_call_operand.vmem [shape: f32[2,8,64], index: 4, kind: output, shape index: {}]  }
   0x1 LB: > { %s152_s18 = sshll.u32 %s1936_s3, 4  ;;  %s1546_s19 = sadd.s32 4294967295, %s1699_s15   ;;  %s1699_s15 = sphi %s1738_s15, %s15_s15   ;;  %s153_s18 = int_to_ptr.hbm [resolvable:$true] %s152_s18 }
   0x2   : > { %p1548_p0 = scmp.ge.s32.totalorder %s1699_s15, 1  ;;  %p135_p1 = scmp.lt.s32.totalorder %s1699_s15, 3 }
   0x3   : > { %p1636_p2 = scmp.eq.s32.totalorder %s1546_s19, 0  ;;  %s1701_s20 = smov [#allocation2]  }
   0x4   : > { %p136_p3 = pnand %p1548_p0, %p135_p1  ;;  %s154_s21 = sshll.u32 %s1701_s20, 4  ;;  %s155_s21 = int_to_ptr.vmem [resolvable:$true] %s154_s21 }
   0x5   : > { %s1702_s22 = smov 128   ;;  %s1703_s23 = smov 8  }
   0x6   : > { %p1632_p4 = pneg %p136_p3  ;;  %178 = sbr.rel (%p136_p3) target bundleno = 525 (0x20d), region = 36 }
   0x8   : > { %p1633_p5 = pnand %p1636_p2, %p1632_p4 }
   0xa   : > { %1635 = dma.hbm_to_vmem [thread:$0]  (!%p1633_p5), %s153_s18, 22016, %s155_s21, [#allocation3], %s1702_s22, %s1702_s22, %s1703_s23  }
   0xb   : > { %1694 = dma.done.wait (%p1636_p2), [#allocation3], 22016  }
   0xc   : > { %1696 = vsyncadd (%p1636_p2), [#allocation3], 4294945280  ;;  %p204_p6 = scmp.lt.s32.totalorder %s1546_s19, 1  ;;  %s1704_s28 = smov 127   ;;  %vm239_vm0 = vcmask 1043456   ;;  %vm235_vm1 = vcmask 31744  }
   0xd   : > { %s1705_s29 = smov 126   ;;  %s1706_s30 = smov 110   ;;  %v1568_v40 = vld [vmem:[%s1934_s1 + $0x10] sm:$0xff]  ;;  %v1555_v41 = vld [vmem:[%s1934_s1 + $0x8] sm:$0xff]  ;;  %vm232_vm2 = vcmask 1039360   ;;  %vm399_vm3 = vcmask 1031168  }
   0xe   : > { %s1939_s19 = smov (!%p204_p6, %s1546_s19), 1  ;;  %s1707_s5 = smov 109   ;;  %v215_v46 = vld [vmem:[%s1934_s1] sm:$0xff]  ;;  %vm492_vm4 = vcmask 900096   ;;  %v1575_v52 = vld [vmem:[%s1934_s1 + $0x18] sm:$0xff]  ;;  %vm585_vm5 = vcmask 891904  }
   0xf   : > { %s1627_s24 = smul.u32 12, %s1939_s19  ;;  %s1708_s6 = smov 108   ;;  %v1582_v59 = vld [vmem:[%s1934_s1 + $0x20] sm:$0xff]  ;;  %vm678_vm6 = vcmask 883712   ;;  %vm771_vm7 = vcmask 752640   ;;  %vm864_vm8 = vcmask 744448  }
  0x10   : > { %s1709_s7 = smov 92   ;;  %s1710_s8 = smov 91   ;;  %vm957_vm9 = vcmask 736256   ;;  %vm1091_vm10 = vcmask 1046528   ;;  %vm1087_vm11 = vcmask 711680   ;;  %vm1479_vm12 = vcmask 523264  }
  0x11   : > { %s1755_s27 = scalar_lea.vmem %s1933_s0, %s1627_s24  ;;  %s1711_s9 = smov 90  }
  0x12   : > { %v1758_v0 = vld [vmem:[%s1755_s27] sm:$0xff]  ;;  %v214_v1 = vld [vmem:[%s1755_s27 + $0x8] sm:$0xf] }
  0x13   : > { %220 = vst [vmem:[#allocation1] ss:$2 sm:$0xff] %v1758_v0  ;;  %v382_v5 = vld [vmem:[%s1755_s27 + $0x8] sm:$0xf] }
  0x14   : > { %222 = vst [vmem:[#allocation1 + $0x10] ss:$2 sm:$0xff] %v214_v1  ;;  %v475_v9 = vld [vmem:[%s1755_s27 + $0x8] sm:$0xf] }
  0x15   : > { %v568_v13 = vld [vmem:[%s1755_s27 + $0x8] sm:$0xf] }
  0x16   : > { %v661_v17 = vld [vmem:[%s1755_s27 + $0x8] sm:$0xf] }
  0x17   : > { %v754_v21 = vld [vmem:[%s1755_s27 + $0x8] sm:$0xf] }
  0x18   : > { %v847_v25 = vld [vmem:[%s1755_s27 + $0x8] sm:$0xf] }
  0x19   : > { %v940_v29 = vld [vmem:[%s1755_s27 + $0x8] sm:$0xf] }
  0x1a   : > { %v223_v2 = vld.sshfl [vmem:[#allocation1] sm:$0xff pattern:$0x75316420]  ;;  %v224_v3 = vld.sshfl [vmem:[#allocation1 + $0x8] sm:$0xff pattern:$0x75316420] }
  0x1b   : > { %226 = vrot.lane.b32.xlu0 %v223_v2, %s1704_s28  ;;  %306 = vst [vmem:[#allocation1] ss:$2 sm:$0xff] %v1758_v0  ;;  %v225_v4 = vld.sshfl [vmem:[#allocation1 + $0x10] sm:$0xff pattern:$0x75316420]  ;;  %v1712_v2 = vmov 0  }
  0x1c   : > { %230 = vrot.lane.b32.xlu1 %v225_v4, %s1704_s28  ;;  %308 = vst [vmem:[#allocation1 + $0x10] ss:$2 sm:$0xff] %v214_v1  ;;  %v1032_v1 = vld [vmem:[%s1935_s2] sm:$0xff]  ;;  %1658 = vset.pattern.permute.xlu0 %v1712_v2  ;;  %v1050_v2 = vld [vmem:[#allocation2 + $0x30] sm:$0xff] }
  0x22   : > { %v1764_v6 = vld.sshfl [vmem:[#allocation1] sm:$0xff pattern:$0x75316420]  ;;  %v1766_v7 = vld.sshfl [vmem:[#allocation1 + $0x8] sm:$0xff pattern:$0x75316420] }
  0x23   : > { %228 = vrot.lane.b32.xlu0 %v224_v3, %s1704_s28  ;;  %387 = vst [vmem:[#allocation1] ss:$2 sm:$0xff] %v1758_v0  ;;  %v1769_v8 = vld.sshfl [vmem:[#allocation1 + $0x10] sm:$0xff pattern:$0x75316420] }
  0x24   : > { %389 = vst [vmem:[#allocation1 + $0x10] ss:$2 sm:$0xff] %v382_v5 }
  0x2a   : > { %v390_v10 = vld.sshfl [vmem:[#allocation1] sm:$0xff pattern:$0x75316420]  ;;  %v391_v11 = vld.sshfl [vmem:[#allocation1 + $0x8] sm:$0xff pattern:$0x75316420] }
  0x2b   : > { %393 = vrot.lane.b32.xlu1 %v390_v10, %s1705_s29  ;;  %480 = vst [vmem:[#allocation1] ss:$2 sm:$0xff] %v1758_v0  ;;  %395 = vrot.lane.b32.xlu2 %v391_v11, %s1705_s29  ;;  %v392_v12 = vld.sshfl [vmem:[#allocation1 + $0x10] sm:$0xff pattern:$0x75316420] }
  0x2c   : > { %482 = vst [vmem:[#allocation1 + $0x10] ss:$2 sm:$0xff] %v475_v9 }
  0x32   : > { %v483_v14 = vld.sshfl [vmem:[#allocation1] sm:$0xff pattern:$0x75316420]  ;;  %v484_v15 = vld.sshfl [vmem:[#allocation1 + $0x8] sm:$0xff pattern:$0x75316420] }
  0x33   : > { %488 = vrot.lane.b32.xlu0 %v484_v15, %s1706_s30  ;;  %v485_v16 = vld.sshfl [vmem:[#allocation1 + $0x10] sm:$0xff pattern:$0x75316420]  ;;  %397 = vrot.lane.b32.xlu2 %v392_v12, %s1705_s29  ;;  %573 = vst [vmem:[#allocation1] ss:$2 sm:$0xff] %v1758_v0 }
  0x34   : > { %575 = vst [vmem:[#allocation1 + $0x10] ss:$2 sm:$0xff] %v568_v13  ;;  %490 = vrot.lane.b32.xlu1 %v485_v16, %s1706_s30  ;;  %v1603_v13 = vld [vmem:[%s1934_s1 + $0x38] sm:$0xff] }
  0x3a   : > { %v577_v18 = vld.sshfl [vmem:[#allocation1 + $0x8] sm:$0xff pattern:$0x75316420]  ;;  %v576_v19 = vld.sshfl [vmem:[#allocation1] sm:$0xff pattern:$0x75316420] }
  0x3b   : > { %v578_v20 = vld.sshfl [vmem:[#allocation1 + $0x10] sm:$0xff pattern:$0x75316420]  ;;  %666 = vst [vmem:[#allocation1] ss:$2 sm:$0xff] %v1758_v0  ;;  %486 = vrot.lane.b32.xlu2 %v483_v14, %s1706_s30 }
  0x3c   : > { %668 = vst [vmem:[#allocation1 + $0x10] ss:$2 sm:$0xff] %v661_v17  ;;  %583 = vrot.lane.b32.xlu0 %v578_v20, %s1707_s5  ;;  %581 = vrot.lane.b32.xlu1 %v577_v18, %s1707_s5  ;;  %v1610_v20 = vld [vmem:[%s1934_s1 + $0x40] sm:$0xff] }
  0x42   : > { %v670_v22 = vld.sshfl [vmem:[#allocation1 + $0x8] sm:$0xff pattern:$0x75316420]  ;;  %v669_v23 = vld.sshfl [vmem:[#allocation1] sm:$0xff pattern:$0x75316420] }
  0x43   : > { %v671_v24 = vld.sshfl [vmem:[#allocation1 + $0x10] sm:$0xff pattern:$0x75316420]  ;;  %759 = vst [vmem:[#allocation1] ss:$2 sm:$0xff] %v1758_v0  ;;  %672 = vrot.lane.b32.xlu2 %v669_v23, %s1708_s6  ;;  %v1075_v23 = vld [vmem:[#allocation2 + $0xf8] sm:$0xff] }
  0x44   : > { %761 = vst [vmem:[#allocation1 + $0x10] ss:$2 sm:$0xff] %v754_v21  ;;  %674 = vrot.lane.b32.xlu0 %v670_v22, %s1708_s6 }
  0x4a   : > { %v763_v26 = vld.sshfl [vmem:[#allocation1 + $0x8] sm:$0xff pattern:$0x75316420]  ;;  %v762_v27 = vld.sshfl [vmem:[#allocation1] sm:$0xff pattern:$0x75316420] }
  0x4b   : > { %765 = vrot.lane.b32.xlu1 %v762_v27, %s1709_s7  ;;  %852 = vst [vmem:[#allocation1] ss:$2 sm:$0xff] %v1758_v0  ;;  %v764_v28 = vld.sshfl [vmem:[#allocation1 + $0x10] sm:$0xff pattern:$0x75316420]  ;;  %767 = vrot.lane.b32.xlu2 %v763_v26, %s1709_s7 }
  0x4c   : > { %579 = vrot.lane.b32.xlu0 %v576_v19, %s1707_s5  ;;  %854 = vst [vmem:[#allocation1 + $0x10] ss:$2 sm:$0xff] %v847_v25  ;;  %v1074_v25 = vld [vmem:[#allocation2 + $0xf0] sm:$0xff]  ;;  %v1170_v26 = vld [vmem:[#allocation2 + $0x1c8] sm:$0xff] }
  0x4d   : > { %v1073_v27 = vld [vmem:[#allocation2 + $0xe8] sm:$0xff] }
  0x52   : > { %v855_v30 = vld.sshfl [vmem:[#allocation1] sm:$0xff pattern:$0x75316420]  ;;  %v856_v31 = vld.sshfl [vmem:[#allocation1 + $0x8] sm:$0xff pattern:$0x75316420] }
  0x53   : > { %769 = vrot.lane.b32.xlu1 %v764_v28, %s1709_s7  ;;  %v857_v32 = vld.sshfl [vmem:[#allocation1 + $0x10] sm:$0xff pattern:$0x75316420]  ;;  %676 = vrot.lane.b32.xlu2 %v671_v24, %s1708_s6  ;;  %945 = vst [vmem:[#allocation1] ss:$2 sm:$0xff] %v1758_v0  ;;  %v1589_v0 = vld [vmem:[%s1934_s1 + $0x28] sm:$0xff] }
  0x54   : > { %860 = vrot.lane.b32.xlu0 %v856_v31, %s1710_s8  ;;  %947 = vst [vmem:[#allocation1 + $0x10] ss:$2 sm:$0xff] %v940_v29  ;;  %v1171_v24 = vld [vmem:[#allocation2 + $0x1d0] sm:$0xff]  ;;  %v1169_v28 = vld [vmem:[#allocation2 + $0x1c0] sm:$0xff]  ;;  %v1071_v31 = vld [vmem:[#allocation2 + $0xd8] sm:$0xff]  ;;  %s1554_s6 = sshll.u32 %s1939_s19, 3 }
  0x55   : > { %v1072_v29 = vld [vmem:[#allocation2 + $0xe0] sm:$0xff] }
  0x5a   : > { %v949_v34 = vld.sshfl [vmem:[#allocation1 + $0x8] sm:$0xff pattern:$0x75316420]  ;;  %v948_v35 = vld.sshfl [vmem:[#allocation1] sm:$0xff pattern:$0x75316420] }
  0x5b   : > { %862 = vrot.lane.b32.xlu1 %v857_v32, %s1710_s8  ;;  %v950_v33 = vld.sshfl [vmem:[#allocation1 + $0x10] sm:$0xff pattern:$0x75316420]  ;;  %858 = vrot.lane.b32.xlu2 %v855_v30, %s1710_s8  ;;  %v1168_v30 = vld [vmem:[#allocation2 + $0x1b8] sm:$0xff]  ;;  %v1167_v32 = vld [vmem:[#allocation2 + $0x1b0] sm:$0xff] }
  0x5c   : > { %955 = vrot.lane.b32.xlu0 %v950_v33, %s1711_s9  ;;  %v1059_v33 = vld [vmem:[#allocation2 + $0x78] sm:$0xff] }
  0x63   : > { %953 = vrot.lane.b32.xlu1 %v949_v34, %s1711_s9  ;;  %951 = vrot.lane.b32.xlu2 %v948_v35, %s1711_s9  ;;  %v1070_v34 = vld [vmem:[#allocation2 + $0xd0] sm:$0xff]  ;;  %v1166_v35 = vld [vmem:[#allocation2 + $0x1a8] sm:$0xff]  ;;  %s212_s9 = scalar_lea.vmem %s1937_s4, %s1554_s6 }
  0x64   : > { %1035 = vperm.xlu0 %1658, %v1032_v1   ;;  %v1158_v1 = vld [vmem:[#allocation2 + $0x168] sm:$0xff] }
  0x85   : > { %v396_v36 = vpop.permute.xlu2 %395 }
  0x8d   : > { %v227_v37 = vpop.permute.xlu0 %226  ;;  %v398_v38 = vpop.permute.xlu2 %397 }
  0x8e   : > { %v231_v39 = vpop.permute.xlu1 %230  ;;  %1573 = vmatpush.msk.msra.mxu0 %vm239_vm0, %v398_v38  ;;  %v401_v49 = vsel %vm399_vm3, %v396_v36, %v398_v38  ;;  %v1165_v38 = vld [vmem:[#allocation2 + $0x1a0] sm:$0xff] }
  0x8f   : > { %1560 = vmatpush.msk.msra.mxu2 %vm239_vm0, %v231_v39  ;;  %1574 = vmatmul.msk.f32.vlgmr.msra.gmra.mxu0 %vm235_vm1, %v1568_v40 }
  0x90   : > { %1561 = vmatmul.msk.f32.vlgmr.msra.gmra.mxu2 %vm235_vm1, %v1555_v41 }
  0x95   : > { %v229_v42 = vpop.permute.xlu0 %228  ;;  %v487_v43 = vpop.permute.xlu2 %486 }
  0x96   : > { %v233_v44 = vsel %vm232_vm2, %v227_v37, %v229_v42  ;;  %v234_v45 = vsel %vm232_vm2, %v229_v42, %v231_v39  ;;  %v1069_v37 = vld [vmem:[#allocation2 + $0xc8] sm:$0xff]  ;;  %v1056_v42 = vld [vmem:[#allocation2 + $0x60] sm:$0xff] }
  0x97   : > { %1556 = vmatpush.msk.msra.mxu3 %vm239_vm0, %v233_v44  ;;  %1558 = vmatpush.msk.msra.mxu1 %vm239_vm0, %v234_v45  ;;  %v1057_v39 = vld [vmem:[#allocation2 + $0x68] sm:$0xff]  ;;  %v1086_v44 = vld [vmem:[#allocation2 + $0x150] sm:$0x7f] }
  0x98   : > { %1557 = vmatmul.msk.f32.vlgmr.msra.gmra.mxu3 %vm235_vm1, %v1555_v41  ;;  %1559 = vmatmul.msk.f32.vlgmr.msra.gmra.mxu1 %vm235_vm1, %v1555_v41  ;;  %v1164_v41 = vld [vmem:[#allocation2 + $0x198] sm:$0xff]  ;;  %v1163_v45 = vld [vmem:[#allocation2 + $0x190] sm:$0xff] }
  0x99   : > { %1562 = vmatpush.msk.msrb.mxu3 %vm239_vm0, %v1764_v6  ;;  %1566 = vmatpush.msk.msrb.mxu1 %vm239_vm0, %v1769_v8  ;;  %v1596_v6 = vld [vmem:[%s1934_s1 + $0x30] sm:$0xff] }
  0x9b   : > { %1564 = vmatpush.msk.msra.mxu3 %vm239_vm0, %v1766_v7 }
  0x9d   : > { %v394_v47 = vpop.permute.xlu1 %393  ;;  %v673_v48 = vpop.permute.xlu2 %672 }
  0x9e   : > { %v400_v50 = vsel %vm399_vm3, %v394_v47, %v396_v36  ;;  %v1058_v36 = vld [vmem:[#allocation2 + $0x70] sm:$0xff] }
  0x9f   : > { %1569 = vmatpush.msk.msrb.mxu2 %vm239_vm0, %v400_v50  ;;  %v1066_v47 = vld [vmem:[#allocation2 + $0xb0] sm:$0xff] }
  0xa0   : > { %1563 = vmatmul.msk.f32.vlgmr.msrb.gmra.mxu3 %vm235_vm1, %v215_v46  ;;  %1567 = vmatmul.msk.f32.vlgmr.msrb.gmra.mxu1 %vm235_vm1, %v215_v46  ;;  %v1054_v50 = vld [vmem:[#allocation2 + $0x50] sm:$0xff] }
  0xa1   : > { %1571 = vmatpush.msk.msrb.mxu3 %vm239_vm0, %v401_v49  ;;  %1570 = vmatmul.msk.f32.vlgmr.msrb.gmra.mxu2 %vm235_vm1, %v1568_v40  ;;  %v1162_v49 = vld [vmem:[#allocation2 + $0x188] sm:$0xff] }
  0xa5   : > { %v489_v51 = vpop.permute.xlu0 %488  ;;  %v768_v56 = vpop.permute.xlu2 %767 }
  0xa6   : > { %v493_v53 = vsel %vm492_vm4, %v487_v43, %v489_v51  ;;  %v491_v54 = vpop.permute.xlu1 %490  ;;  %v1067_v43 = vld [vmem:[#allocation2 + $0xb8] sm:$0xff] }
  0xa7   : > { %v494_v55 = vsel %vm492_vm4, %v489_v51, %v491_v54  ;;  %1576 = vmatpush.msk.msra.mxu1 %vm239_vm0, %v493_v53  ;;  %v1065_v51 = vld [vmem:[#allocation2 + $0xa8] sm:$0xff]  ;;  %v1161_v53 = vld [vmem:[#allocation2 + $0x180] sm:$0xff] }
  0xa8   : > { %1565 = vmatmul.msk.f32.vlgmr.msra.gmra.mxu3 %vm235_vm1, %v215_v46  ;;  %1577 = vmatmul.msk.f32.vlgmr.msra.gmra.mxu1 %vm235_vm1, %v1575_v52  ;;  %v1055_v46 = vld [vmem:[#allocation2 + $0x58] sm:$0xff] }
  0xa9   : > { %1580 = vmatpush.msk.msra.mxu3 %vm239_vm0, %v491_v54  ;;  %1578 = vmatpush.msk.msra.mxu2 %vm239_vm0, %v494_v55  ;;  %v1053_v54 = vld [vmem:[#allocation2 + $0x48] sm:$0xff]  ;;  %v1064_v55 = vld [vmem:[#allocation2 + $0xa0] sm:$0xff] }
  0xaa   : > { %1579 = vmatmul.msk.f32.vlgmr.msra.gmra.mxu2 %vm235_vm1, %v1575_v52 }
  0xad   : > { %v677_v61 = vpop.permute.xlu2 %676 }
  0xae   : > { %v584_v57 = vpop.permute.xlu0 %583  ;;  %v582_v58 = vpop.permute.xlu1 %581 }
  0xaf   : > { %v587_v60 = vsel %vm585_vm5, %v582_v58, %v584_v57  ;;  %1587 = vmatpush.msk.msrb.mxu2 %vm239_vm0, %v584_v57  ;;  %v1160_v57 = vld [vmem:[#allocation2 + $0x178] sm:$0xff] }
  0xb0   : > { %1572 = vmatmul.msk.f32.vlgmr.msrb.gmra.mxu3 %vm235_vm1, %v1568_v40  ;;  %1585 = vmatpush.msk.msrb.mxu1 %vm239_vm0, %v587_v60  ;;  %v1068_v40 = vld [vmem:[#allocation2 + $0xc0] sm:$0xff]  ;;  %v1082_v60 = vld [vmem:[#allocation2 + $0x130] sm:$0xff] }
  0xb1   : > { %1586 = vmatmul.msk.f32.vlgmr.msrb.gmra.mxu1 %vm235_vm1, %v1582_v59 }
  0xb2   : > { %1588 = vmatmul.msk.f32.vlgmr.msrb.gmra.mxu2 %vm235_vm1, %v1582_v59  ;;  %1594 = vmatpush.msk.msra.mxu1 %vm239_vm0, %v677_v61 }
  0xb5   : > { %v859_v9 = vpop.permute.xlu2 %858 }
  0xb6   : > { %v675_v62 = vpop.permute.xlu0 %674 }
  0xb7   : > { %v679_v63 = vsel %vm678_vm6, %v673_v48, %v675_v62  ;;  %v680_v7 = vsel %vm678_vm6, %v675_v62, %v677_v61  ;;  %v1085_v48 = vld [vmem:[#allocation2 + $0x148] sm:$0xff]  ;;  %v1159_v61 = vld [vmem:[#allocation2 + $0x170] sm:$0xff]  ;;  %v1051_v62 = vld [vmem:[#allocation2 + $0x38] sm:$0xff] }
  0xb8   : > { %1581 = vmatmul.msk.f32.vlgmr.msra.gmra.mxu3 %vm235_vm1, %v1575_v52  ;;  %v1084_v52 = vld [vmem:[#allocation2 + $0x140] sm:$0xff] }
  0xb9   : > { %1590 = vmatpush.msk.msrb.mxu3 %vm239_vm0, %v679_v63  ;;  %1595 = vmatmul.msk.f32.vlgmr.msra.gmra.mxu1 %vm235_vm1, %v1589_v0  ;;  %v1062_v63 = vld [vmem:[#allocation2 + $0x90] sm:$0xff] }
  0xbd   : > { %v766_v3 = vpop.permute.xlu1 %765  ;;  %v952_v18 = vpop.permute.xlu2 %951 }
  0xbe   : > { %v580_v4 = vpop.permute.xlu0 %579  ;;  %v772_v5 = vsel %vm771_vm7, %v766_v3, %v768_v56  ;;  %v1061_v3 = vld [vmem:[#allocation2 + $0x88] sm:$0xff] }
  0xbf   : > { %v586_v8 = vsel %vm585_vm5, %v580_v4, %v582_v58  ;;  %1597 = vmatpush.msk.msra.mxu2 %vm239_vm0, %v772_v5  ;;  %v1052_v58 = vld [vmem:[#allocation2 + $0x40] sm:$0xff] }
  0xc0   : > { %1583 = vmatpush.msk.msrb.mxu0 %vm239_vm0, %v586_v8  ;;  %1591 = vmatmul.msk.f32.vlgmr.msrb.gmra.mxu3 %vm235_vm1, %v1589_v0  ;;  %v1080_v4 = vld [vmem:[#allocation2 + $0x120] sm:$0xff] }
  0xc1   : > { %1584 = vmatmul.msk.f32.vlgmr.msrb.gmra.mxu0 %vm235_vm1, %v1582_v59  ;;  %1598 = vmatmul.msk.f32.vlgmr.msra.gmra.mxu2 %vm235_vm1, %v1596_v6  ;;  %v1063_v59 = vld [vmem:[#allocation2 + $0x98] sm:$0xff]  ;;  %v1157_v5 = vld [vmem:[#allocation2 + $0x160] sm:$0xff] }
  0xc2   : > { %1592 = vmatpush.msk.msra.mxu0 %vm239_vm0, %v680_v7  ;;  %v1049_v7 = vld [vmem:[#allocation2 + $0x28] sm:$0xff]  ;;  %v1060_v8 = vld [vmem:[#allocation2 + $0x80] sm:$0xff] }
  0xc5   : > { %v770_v10 = vpop.permute.xlu1 %769 }
  0xc6   : > { %v773_v11 = vsel %vm771_vm7, %v768_v56, %v770_v10  ;;  %1601 = vmatpush.msk.msrb.mxu0 %vm239_vm0, %v770_v10  ;;  %v861_v12 = vpop.permute.xlu0 %860  ;;  %v1083_v56 = vld [vmem:[#allocation2 + $0x138] sm:$0xff] }
  0xc7   : > { %v865_v14 = vsel %vm864_vm8, %v859_v9, %v861_v12  ;;  %1599 = vmatpush.msk.msra.mxu3 %vm239_vm0, %v773_v11  ;;  %v1079_v9 = vld [vmem:[#allocation2 + $0x118] sm:$0xff] }
  0xc8   : > { %1600 = vmatmul.msk.f32.vlgmr.msra.gmra.mxu3 %vm235_vm1, %v1596_v6  ;;  %1604 = vmatpush.msk.msrb.mxu1 %vm239_vm0, %v865_v14  ;;  %v1156_v11 = vld [vmem:[#allocation2 + $0x158] sm:$0xff]  ;;  %v1048_v14 = vld [vmem:[#allocation2 + $0x20] sm:$0xff] }
  0xc9   : > { %1593 = vmatmul.msk.f32.vlgmr.msra.gmra.mxu0 %vm235_vm1, %v1589_v0  ;;  %1605 = vmatmul.msk.f32.vlgmr.msrb.gmra.mxu1 %vm235_vm1, %v1603_v13  ;;  %v1081_v0 = vld [vmem:[#allocation2 + $0x128] sm:$0xff] }
  0xcd   : > { %v863_v15 = vpop.permute.xlu1 %862 }
  0xce   : > { %v866_v16 = vsel %vm864_vm8, %v861_v12, %v863_v15  ;;  %1608 = vmatpush.msk.msrb.mxu3 %vm239_vm0, %v863_v15  ;;  %v956_v17 = vpop.permute.xlu0 %955  ;;  %v1278_v12 = vld [vmem:[#allocation2 + $0x328] sm:$0xff]  ;;  %v1078_v15 = vld [vmem:[#allocation2 + $0x110] sm:$0xff] }
  0xcf   : > { %1606 = vmatpush.msk.msrb.mxu2 %vm239_vm0, %v866_v16  ;;  %v1277_v16 = vld [vmem:[#allocation2 + $0x320] sm:$0xff] }
  0xd0   : > { %1607 = vmatmul.msk.f32.vlgmr.msrb.gmra.mxu2 %vm235_vm1, %v1603_v13  ;;  %1609 = vmatmul.msk.f32.vlgmr.msrb.gmra.mxu3 %vm235_vm1, %v1603_v13  ;;  %v1294_v13 = vld [vmem:[#allocation2 + $0x3a8] sm:$0xff] }
  0xd1   : > { %1602 = vmatmul.msk.f32.vlgmr.msrb.gmra.mxu0 %vm235_vm1, %v1596_v6  ;;  %1615 = vmatpush.msk.msra.mxu2 %vm239_vm0, %v956_v17 }
  0xd2   : > { %1095 = vmatpush.msra.mxu3 %v1059_v33 }
  0xd3   : > { %1202 = vmatpush.msrb.mxu2 %v1171_v24 }
  0xd4   : > { %1096 = vmatpush.msra.mxu3 %v1058_v36  ;;  %v1198_v36 = vld [vmem:[#allocation2 + $0x2a8] sm:$0x7f] }
  0xd5   : > { %v954_v19 = vpop.permute.xlu1 %953  ;;  %1203 = vmatpush.msrb.mxu2 %v1170_v26  ;;  %v1275_v26 = vld [vmem:[#allocation2 + $0x310] sm:$0xff] }
  0xd6   : > { %v959_v21 = vsel %vm957_vm9, %v954_v19, %v956_v17  ;;  %v958_v22 = vsel %vm957_vm9, %v952_v18, %v954_v19  ;;  %1097 = vmatpush.msra.mxu3 %v1057_v39  ;;  %v1293_v17 = vld [vmem:[#allocation2 + $0x3a0] sm:$0xff]  ;;  %v1047_v18 = vld [vmem:[#allocation2 + $0x18] sm:$0xff]  ;;  %v1077_v19 = vld [vmem:[#allocation2 + $0x108] sm:$0xff] }
  0xd7   : > { %1611 = vmatpush.msk.msra.mxu0 %vm239_vm0, %v958_v22  ;;  %1613 = vmatpush.msk.msra.mxu1 %vm239_vm0, %v959_v21  ;;  %v1292_v21 = vld [vmem:[#allocation2 + $0x398] sm:$0xff]  ;;  %v1046_v22 = vld [vmem:[#allocation2 + $0x10] sm:$0xff] }
  0xd8   : > { %1614 = vmatmul.msk.f32.vlgmr.msra.gmra.mxu1 %vm235_vm1, %v1610_v20  ;;  %1616 = vmatmul.msk.f32.vlgmr.msra.gmra.mxu2 %vm235_vm1, %v1610_v20  ;;  %v1184_v39 = vld [vmem:[#allocation2 + $0x238] sm:$0xff] }
  0xd9   : > { %1612 = vmatmul.msk.f32.vlgmr.msra.gmra.mxu0 %vm235_vm1, %v1610_v20  ;;  %1204 = vmatpush.msrb.mxu2 %v1169_v28  ;;  %v1276_v20 = vld [vmem:[#allocation2 + $0x318] sm:$0xff] }
  0xda   : > { %1115 = vmatpush.msrb.mxu0 %v1075_v23  ;;  %1617 = vmatpush.msk.msrb.mxu1 %vm1091_vm10, %v1086_v44  ;;  %v1076_v23 = vld [vmem:[#allocation2 + $0x100] sm:$0xff]  ;;  %v1183_v44 = vld [vmem:[#allocation2 + $0x230] sm:$0xff] }
  0xdb   : > { %1205 = vmatpush.msrb.mxu2 %v1168_v30  ;;  %1098 = vmatpush.msra.mxu3 %v1056_v42  ;;  %v1186_v30 = vld [vmem:[#allocation2 + $0x248] sm:$0xff]  ;;  %v1288_v42 = vld [vmem:[#allocation2 + $0x378] sm:$0xff] }
  0xdc   : > { %1116 = vmatpush.msrb.mxu0 %v1074_v25  ;;  %1141 = vmatpush.msrb.mxu1 %v1085_v48  ;;  %v1187_v25 = vld [vmem:[#allocation2 + $0x250] sm:$0xff]  ;;  %v1182_v48 = vld [vmem:[#allocation2 + $0x228] sm:$0xff] }
  0xdd   : > { %1206 = vmatpush.msrb.mxu2 %v1167_v32  ;;  %1099 = vmatpush.msra.mxu3 %v1055_v46  ;;  %v1290_v32 = vld [vmem:[#allocation2 + $0x388] sm:$0xff]  ;;  %v1271_v46 = vld [vmem:[#allocation2 + $0x2f0] sm:$0xff] }
  0xde   : > { %1117 = vmatpush.msrb.mxu0 %v1073_v27  ;;  %1142 = vmatpush.msrb.mxu1 %v1084_v52  ;;  %v1291_v27 = vld [vmem:[#allocation2 + $0x390] sm:$0xff]  ;;  %v1286_v52 = vld [vmem:[#allocation2 + $0x368] sm:$0xff] }
  0xdf   : > { %1207 = vmatpush.msrb.mxu2 %v1166_v35  ;;  %1100 = vmatpush.msra.mxu3 %v1054_v50  ;;  %v1185_v35 = vld [vmem:[#allocation2 + $0x240] sm:$0xff]  ;;  %v1270_v50 = vld [vmem:[#allocation2 + $0x2e8] sm:$0xff] }
  0xe0   : > { %1118 = vmatpush.msrb.mxu0 %v1072_v29  ;;  %1143 = vmatpush.msrb.mxu1 %v1083_v56  ;;  %v1045_v29 = vld [vmem:[#allocation2 + $0x8] sm:$0xff]  ;;  %v1285_v56 = vld [vmem:[#allocation2 + $0x360] sm:$0xff] }
  0xe1   : > { %1208 = vmatpush.msrb.mxu2 %v1165_v38  ;;  %1101 = vmatpush.msra.mxu3 %v1053_v54  ;;  %v1289_v38 = vld [vmem:[#allocation2 + $0x380] sm:$0xff]  ;;  %v1194_v54 = vld [vmem:[#allocation2 + $0x288] sm:$0xff] }
  0xe2   : > { %1119 = vmatpush.msrb.mxu0 %v1071_v31  ;;  %1144 = vmatpush.msrb.mxu1 %v1082_v60  ;;  %v1274_v31 = vld [vmem:[#allocation2 + $0x308] sm:$0xff]  ;;  %v1268_v60 = vld [vmem:[#allocation2 + $0x2d8] sm:$0xff] }
  0xe3   : > { %1209 = vmatpush.msrb.mxu2 %v1164_v41  ;;  %1102 = vmatpush.msra.mxu3 %v1052_v58  ;;  %v1272_v41 = vld [vmem:[#allocation2 + $0x2f8] sm:$0xff] }
  0xe4   : > { %1120 = vmatpush.msrb.mxu0 %v1070_v34  ;;  %1145 = vmatpush.msrb.mxu1 %v1081_v0  ;;  %v1044_v34 = vld [vmem:[#allocation2] sm:$0xff]  ;;  %v1192_v0 = vld [vmem:[#allocation2 + $0x278] sm:$0xff] }
  0xe5   : > { %1210 = vmatpush.msrb.mxu2 %v1163_v45  ;;  %1103 = vmatpush.msra.mxu3 %v1051_v62  ;;  %v1196_v45 = vld [vmem:[#allocation2 + $0x298] sm:$0xff] }
  0xe6   : > { %1121 = vmatpush.msrb.mxu0 %v1069_v37  ;;  %1146 = vmatpush.msrb.mxu1 %v1080_v4  ;;  %v1273_v37 = vld [vmem:[#allocation2 + $0x300] sm:$0xff]  ;;  %v1178_v4 = vld [vmem:[#allocation2 + $0x208] sm:$0xff] }
  0xe7   : > { %1211 = vmatpush.msrb.mxu2 %v1162_v49  ;;  %1104 = vmatpush.msra.mxu3 %v1050_v2  ;;  %v1195_v49 = vld [vmem:[#allocation2 + $0x290] sm:$0xff] }
  0xe8   : > { %1122 = vmatpush.msrb.mxu0 %v1068_v40  ;;  %1147 = vmatpush.msrb.mxu1 %v1079_v9  ;;  %v1197_v40 = vld [vmem:[#allocation2 + $0x2a0] sm:$0xff]  ;;  %v1283_v2 = vld [vmem:[#allocation2 + $0x350] sm:$0xff]  ;;  %v1282_v9 = vld [vmem:[#allocation2 + $0x348] sm:$0xff] }
  0xe9   : > { %1212 = vmatpush.msrb.mxu2 %v1161_v53  ;;  %1105 = vmatpush.msra.mxu3 %v1049_v7  ;;  %v1181_v53 = vld [vmem:[#allocation2 + $0x220] sm:$0xff]  ;;  %v1266_v7 = vld [vmem:[#allocation2 + $0x2c8] sm:$0xff] }
  0xea   : > { %1123 = vmatpush.msrb.mxu0 %v1067_v43  ;;  %1148 = vmatpush.msrb.mxu1 %v1078_v15 }
  0xeb   : > { %1213 = vmatpush.msrb.mxu2 %v1160_v57  ;;  %1106 = vmatpush.msra.mxu3 %v1048_v14  ;;  %v1180_v57 = vld [vmem:[#allocation2 + $0x218] sm:$0xff]  ;;  %v1265_v14 = vld [vmem:[#allocation2 + $0x2c0] sm:$0xff] }
  0xec   : > { %1124 = vmatpush.msrb.mxu0 %v1066_v47  ;;  %1149 = vmatpush.msrb.mxu1 %v1077_v19  ;;  %v1287_v47 = vld [vmem:[#allocation2 + $0x370] sm:$0xff] }
  0xed   : > { %1214 = vmatpush.msrb.mxu2 %v1159_v61  ;;  %1107 = vmatpush.msra.mxu3 %v1047_v18  ;;  %v1284_v61 = vld [vmem:[#allocation2 + $0x358] sm:$0xff] }
  0xee   : > { %1125 = vmatpush.msrb.mxu0 %v1065_v51  ;;  %1150 = vmatpush.msrb.mxu1 %v1076_v23  ;;  %v1264_v18 = vld [vmem:[#allocation2 + $0x2b8] sm:$0xff]  ;;  %v1263_v23 = vld [vmem:[#allocation2 + $0x2b0] sm:$0xff] }
  0xef   : > { %1215 = vmatpush.msrb.mxu2 %v1158_v1  ;;  %1108 = vmatpush.msra.mxu3 %v1046_v22  ;;  %v1267_v1 = vld [vmem:[#allocation2 + $0x2d0] sm:$0xff]  ;;  %v1188_v22 = vld [vmem:[#allocation2 + $0x258] sm:$0xff] }
  0xf0   : > { %1126 = vmatpush.msrb.mxu0 %v1064_v55  ;;  %1222 = vmatpush.msra.mxu1 %v1187_v25  ;;  %v1269_v55 = vld [vmem:[#allocation2 + $0x2e0] sm:$0xff]  ;;  %v1279_v25 = vld [vmem:[#allocation2 + $0x330] sm:$0xff] }
  0xf1   : > { %1216 = vmatpush.msrb.mxu2 %v1157_v5  ;;  %1109 = vmatpush.msra.mxu3 %v1045_v29  ;;  %v1191_v5 = vld [vmem:[#allocation2 + $0x270] sm:$0xff] }
  0xf2   : > { %1127 = vmatpush.msrb.mxu0 %v1063_v59  ;;  %1223 = vmatpush.msra.mxu1 %v1186_v30  ;;  %v1193_v59 = vld [vmem:[#allocation2 + $0x280] sm:$0xff] }
  0xf3   : > { %1217 = vmatpush.msrb.mxu2 %v1156_v11  ;;  %1110 = vmatpush.msra.mxu3 %v1044_v34  ;;  %v1281_v11 = vld [vmem:[#allocation2 + $0x340] sm:$0xff] }
  0xf4   : > { %1128 = vmatpush.msrb.mxu0 %v1062_v63  ;;  %1224 = vmatpush.msra.mxu1 %v1185_v35  ;;  %v1179_v63 = vld [vmem:[#allocation2 + $0x210] sm:$0xff]  ;;  %v1172_v35 = vld [vmem:[#allocation2 + $0x1d8] sm:$0xff] }
  0xf5   : > { %1329 = vmatpush.msra.mxu2 %v1294_v13  ;;  %1619 = vmatpush.msk.msrb.mxu3 %vm1091_vm10, %v1198_v36  ;;  %v1190_v13 = vld [vmem:[#allocation2 + $0x268] sm:$0xff] }
  0xf6   : > { %1129 = vmatpush.msrb.mxu0 %v1061_v3  ;;  %1225 = vmatpush.msra.mxu1 %v1184_v39 }
  0xf7   : > { %1330 = vmatpush.msra.mxu2 %v1293_v17  ;;  %1248 = vmatpush.msrb.mxu3 %v1197_v40  ;;  %v1189_v17 = vld [vmem:[#allocation2 + $0x260] sm:$0xff] }
  0xf8   : > { %1130 = vmatpush.msrb.mxu0 %v1060_v8  ;;  %1226 = vmatpush.msra.mxu1 %v1183_v44 }
  0xf9   : > { %1331 = vmatpush.msra.mxu2 %v1292_v21  ;;  %1249 = vmatpush.msrb.mxu3 %v1196_v45  ;;  %v1175_v21 = vld [vmem:[#allocation2 + $0x1f0] sm:$0xff] }
  0xfa   : > { %1309 = vmatpush.msra.mxu0 %v1278_v12  ;;  %1227 = vmatpush.msra.mxu1 %v1182_v48  ;;  %v1177_v12 = vld [vmem:[#allocation2 + $0x200] sm:$0xff] }
  0xfb   : > { %1332 = vmatpush.msra.mxu2 %v1291_v27  ;;  %1250 = vmatpush.msrb.mxu3 %v1195_v49  ;;  %v1174_v27 = vld [vmem:[#allocation2 + $0x1e8] sm:$0xff] }
  0xfc   : > { %1310 = vmatpush.msra.mxu0 %v1277_v16  ;;  %1228 = vmatpush.msra.mxu1 %v1181_v53  ;;  %v1176_v16 = vld [vmem:[#allocation2 + $0x1f8] sm:$0xff] }
  0xfd   : > { %1333 = vmatpush.msra.mxu2 %v1290_v32  ;;  %1251 = vmatpush.msrb.mxu3 %v1194_v54 }
  0xfe   : > { %1311 = vmatpush.msra.mxu0 %v1276_v20  ;;  %1229 = vmatpush.msra.mxu1 %v1180_v57  ;;  %v1280_v20 = vld [vmem:[#allocation2 + $0x338] sm:$0xff] }
  0xff   : > { %1334 = vmatpush.msra.mxu2 %v1289_v38  ;;  %1252 = vmatpush.msrb.mxu3 %v1193_v59 }
 0x100   : > { %1312 = vmatpush.msra.mxu0 %v1275_v26  ;;  %1230 = vmatpush.msra.mxu1 %v1179_v63 }
 0x101   : > { %1335 = vmatpush.msra.mxu2 %v1288_v42  ;;  %1253 = vmatpush.msrb.mxu3 %v1192_v0 }
 0x102   : > { %1313 = vmatpush.msra.mxu0 %v1274_v31  ;;  %1231 = vmatpush.msra.mxu1 %v1178_v4  ;;  %v1173_v31 = vld [vmem:[#allocation2 + $0x1e0] sm:$0xff] }
 0x103   : > { %1336 = vmatpush.msra.mxu2 %v1287_v47  ;;  %1254 = vmatpush.msrb.mxu3 %v1191_v5  ;;  %v1305_v4 = vld [vmem:[#allocation2 + $0x400] sm:$0x7f] }
 0x104   : > { %1314 = vmatpush.msra.mxu0 %v1273_v37  ;;  %1232 = vmatpush.msra.mxu1 %v1177_v12  ;;  %v1401_v5 = vld [vmem:[#allocation2 + $0x500] sm:$0xff] }
 0x105   : > { %1337 = vmatpush.msra.mxu2 %v1286_v52  ;;  %1255 = vmatpush.msrb.mxu3 %v1190_v13  ;;  %v1411_v13 = vld [vmem:[#allocation2 + $0x550] sm:$0xff] }
 0x106   : > { %1315 = vmatpush.msra.mxu0 %v1272_v41  ;;  %1233 = vmatpush.msra.mxu1 %v1176_v16 }
 0x107   : > { %1338 = vmatpush.msra.mxu2 %v1285_v56  ;;  %1256 = vmatpush.msrb.mxu3 %v1189_v17  ;;  %v1410_v17 = vld [vmem:[#allocation2 + $0x548] sm:$0xff] }
 0x108   : > { %1316 = vmatpush.msra.mxu0 %v1271_v46  ;;  %1234 = vmatpush.msra.mxu1 %v1175_v21  ;;  %v1409_v21 = vld [vmem:[#allocation2 + $0x540] sm:$0xff] }
 0x109   : > { %1339 = vmatpush.msra.mxu2 %v1284_v61  ;;  %1257 = vmatpush.msrb.mxu3 %v1188_v22  ;;  %v1301_v22 = vld [vmem:[#allocation2 + $0x3e0] sm:$0xff] }
 0x10a   : > { %1317 = vmatpush.msra.mxu0 %v1270_v50  ;;  %1235 = vmatpush.msra.mxu1 %v1174_v27  ;;  %v1300_v27 = vld [vmem:[#allocation2 + $0x3d8] sm:$0xff] }
 0x10b   : > { %1340 = vmatpush.msra.mxu2 %v1283_v2 }
 0x10c   : > { %1318 = vmatpush.msra.mxu0 %v1269_v55  ;;  %v468_v3 = vpop.f32.mrf.mxu0  ;;  %1236 = vmatpush.msra.mxu1 %v1173_v31  ;;  %v1407_v31 = vld [vmem:[#allocation2 + $0x530] sm:$0xff] }
 0x10d   : > { %1341 = vmatpush.msra.mxu2 %v1282_v9  ;;  %v1304_v9 = vld [vmem:[#allocation2 + $0x3f8] sm:$0xff] }
 0x10e   : > { %1319 = vmatpush.msra.mxu0 %v1268_v60  ;;  %1237 = vmatpush.msra.mxu1 %v1172_v35  ;;  %v1395_v35 = vld [vmem:[#allocation2 + $0x4d0] sm:$0xff] }
 0x10f   : > { %1342 = vmatpush.msra.mxu2 %v1281_v11  ;;  %v1400_v11 = vld [vmem:[#allocation2 + $0x4f8] sm:$0xff] }
 0x110   : > { %1320 = vmatpush.msra.mxu0 %v1267_v1 }
 0x111   : > { %1343 = vmatpush.msra.mxu2 %v1280_v20  ;;  %v1398_v20 = vld [vmem:[#allocation2 + $0x4e8] sm:$0xff] }
 0x112   : > { %1321 = vmatpush.msra.mxu0 %v1266_v7 }
 0x113   : > { %v1883_v28 = vpop.f32.mrf.mxu2  ;;  %1344 = vmatpush.msra.mxu2 %v1279_v25  ;;  %v1397_v25 = vld [vmem:[#allocation2 + $0x4e0] sm:$0xff] }
 0x114   : > { %1322 = vmatpush.msra.mxu0 %v1265_v14  ;;  %v1303_v14 = vld [vmem:[#allocation2 + $0x3f0] sm:$0xff] }
 0x115   : > { %v1879_v10 = vpop.f32.mrf.mxu1 }
 0x116   : > { %1323 = vmatpush.msra.mxu0 %v1264_v18  ;;  %v1302_v18 = vld [vmem:[#allocation2 + $0x3e8] sm:$0xff] }
 0x118   : > { %1324 = vmatpush.msra.mxu0 %v1263_v23  ;;  %v1384_v23 = vld [vmem:[#allocation2 + $0x478] sm:$0xff] }
 0x11b   : > { %v1877_v6 = vpop.f32.mrf.mxu3 }
 0x11d   : > { %v1885_v33 = vpop.f32.mrf.mxu1 }
 0x11e   : > { %v379_v40 = vadd.f32 %v1885_v33, %v1883_v28  ;;  %v1036_v33 = vpop.permute.xlu0 %1035 }
 0x120   : > { %v473_v44 = vadd.f32 %v468_v3, %v379_v40  ;;  %v1405_v40 = vld [vmem:[#allocation2 + $0x520] sm:$0xff] }
 0x123   : > { %v1881_v24 = vpop.f32.mrf.mxu3 }
 0x124   : > { %v1890_v51 = vpop.f32.mrf.mxu2  ;;  %v339_v29 = vadd.f32 %v1881_v24, %v1877_v6 }
 0x125   : > { %v1892_v58 = vpop.f32.mrf.mxu1 }
 0x126   : > { %v471_v37 = vadd.f32 %v1890_v51, %v339_v29  ;;  %v1383_v29 = vld [vmem:[#allocation2 + $0x470] sm:$0xff] }
 0x128   : > { %v564_v41 = vadd.f32 %v1892_v58, %v471_v37  ;;  %v1298_v37 = vld [vmem:[#allocation2 + $0x3c8] sm:$0xff] }
 0x12b   : > { %v1888_v43 = vpop.f32.mrf.mxu3 }
 0x12c   : > { %v359_v36 = vadd.f32 %v1888_v43, %v1879_v10 }
 0x12d   : > { %v541_v8 = vpop.f32.mrf.mxu2 }
 0x12e   : > { %v634_v15 = vpop.f32.mrf.mxu1 }
 0x133   : > { %v448_v62 = vpop.f32.mrf.mxu3 }
 0x134   : > { %v472_v38 = vadd.f32 %v448_v62, %v359_v36  ;;  %v1406_v36 = vld [vmem:[#allocation2 + $0x528] sm:$0xff] }
 0x135   : > { %v654_v30 = vpop.f32.mrf.mxu2 }
 0x136   : > { %v747_v32 = vpop.f32.mrf.mxu1  ;;  %v565_v6 = vadd.f32 %v541_v8, %v472_v38  ;;  %v1412_v8 = vld [vmem:[#allocation2 + $0x558] sm:$0x7f]  ;;  %v1381_v38 = vld [vmem:[#allocation2 + $0x460] sm:$0xff] }
 0x138   : > { %v658_v48 = vadd.f32 %v634_v15, %v565_v6  ;;  %v1399_v15 = vld [vmem:[#allocation2 + $0x4f0] sm:$0xff]  ;;  %v1380_v6 = vld [vmem:[#allocation2 + $0x458] sm:$0xff] }
 0x13b   : > { %v561_v19 = vpop.f32.mrf.mxu3 }
 0x13c   : > { %v566_v49 = vadd.f32 %v561_v19, %v473_v44  ;;  %v1385_v19 = vld [vmem:[#allocation2 + $0x480] sm:$0xff]  ;;  %v1296_v44 = vld [vmem:[#allocation2 + $0x3b8] sm:$0xff] }
 0x13e   : > { %v614_v26 = vpop.f32.mrf.mxu0  ;;  %v659_v51 = vadd.f32 %v654_v30, %v566_v49  ;;  %v1396_v30 = vld [vmem:[#allocation2 + $0x4d8] sm:$0xff]  ;;  %v1378_v49 = vld [vmem:[#allocation2 + $0x448] sm:$0xff] }
 0x13f   : > { %v657_v24 = vadd.f32 %v614_v26, %v564_v41  ;;  %v1408_v26 = vld [vmem:[#allocation2 + $0x538] sm:$0xff]  ;;  %v1297_v41 = vld [vmem:[#allocation2 + $0x3c0] sm:$0xff] }
 0x140   : > { %v752_v56 = vadd.f32 %v747_v32, %v659_v51  ;;  %v1299_v32 = vld [vmem:[#allocation2 + $0x3d0] sm:$0xff]  ;;  %v1390_v51 = vld [vmem:[#allocation2 + $0x4a8] sm:$0xff] }
 0x143   : > { %v707_v34 = vpop.f32.mrf.mxu3 }
 0x144   : > { %v800_v42 = vpop.f32.mrf.mxu2  ;;  %v750_v45 = vadd.f32 %v707_v34, %v657_v24  ;;  %v1382_v34 = vld [vmem:[#allocation2 + $0x468] sm:$0xff]  ;;  %v1393_v24 = vld [vmem:[#allocation2 + $0x4c0] sm:$0xff] }
 0x146   : > { %v727_v39 = vpop.f32.mrf.mxu0  ;;  %v893_v46 = vpop.f32.mrf.mxu1  ;;  %v843_v50 = vadd.f32 %v800_v42, %v750_v45  ;;  %v1404_v42 = vld [vmem:[#allocation2 + $0x518] sm:$0xff]  ;;  %v1379_v45 = vld [vmem:[#allocation2 + $0x450] sm:$0xff] }
 0x147   : > { %v751_v43 = vadd.f32 %v727_v39, %v658_v48  ;;  %v1394_v39 = vld [vmem:[#allocation2 + $0x4c8] sm:$0xff]  ;;  %v1295_v48 = vld [vmem:[#allocation2 + $0x3b0] sm:$0xff] }
 0x148   : > { %v936_v55 = vadd.f32 %v893_v46, %v843_v50  ;;  %v1392_v46 = vld [vmem:[#allocation2 + $0x4b8] sm:$0xff]  ;;  %v1377_v50 = vld [vmem:[#allocation2 + $0x440] sm:$0xff] }
 0x14b   : > { %v820_v47 = vpop.f32.mrf.mxu3 }
 0x14c   : > { %v844_v52 = vadd.f32 %v820_v47, %v751_v43  ;;  %v1403_v47 = vld [vmem:[#allocation2 + $0x510] sm:$0xff]  ;;  %v1402_v43 = vld [vmem:[#allocation2 + $0x508] sm:$0xff] }
 0x14e   : > { %v840_v10 = vpop.f32.mrf.mxu0 }
 0x14f   : > { %v845_v61 = vadd.f32 %v840_v10, %v752_v56  ;;  %v1391_v10 = vld [vmem:[#allocation2 + $0x4b0] sm:$0xff]  ;;  %v1373_v56 = vld [vmem:[#allocation2 + $0x420] sm:$0xff] }
 0x153   : > { %v913_v53 = vpop.f32.mrf.mxu2  ;;  %v933_v59 = vpop.f32.mrf.mxu3 }
 0x154   : > { %v937_v54 = vadd.f32 %v913_v53, %v844_v52  ;;  %v938_v0 = vadd.f32 %v933_v59, %v845_v61  ;;  %v1376_v52 = vld [vmem:[#allocation2 + $0x438] sm:$0xff]  ;;  %v1389_v53 = vld [vmem:[#allocation2 + $0x4a0] sm:$0xff]  ;;  %v1371_v59 = vld [vmem:[#allocation2 + $0x410] sm:$0xff] }
 0x155   : > { %v1006_v28 = vpop.f32.mrf.mxu1 }
 0x156   : > { %v986_v57 = vpop.f32.mrf.mxu0  ;;  %v1030_v58 = vadd.f32 %v1006_v28, %v937_v54  ;;  %v1375_v54 = vld [vmem:[#allocation2 + $0x430] sm:$0xff]  ;;  %v1374_v28 = vld [vmem:[#allocation2 + $0x428] sm:$0xff] }
 0x157   : > { %v1029_v60 = vadd.f32 %v986_v57, %v936_v55  ;;  %v1388_v55 = vld [vmem:[#allocation2 + $0x498] sm:$0xff]  ;;  %v1386_v57 = vld [vmem:[#allocation2 + $0x488] sm:$0xff] }
 0x158   : > { %v1039_v62 = vadd.f32 %v1036_v33, %v1030_v58  ;;  %v1372_v58 = vld [vmem:[#allocation2 + $0x418] sm:$0xff] }
 0x159   : > { %v1038_v63 = vadd.f32 %v1036_v33, %v1029_v60  ;;  %v1370_v60 = vld [vmem:[#allocation2 + $0x408] sm:$0xff] }
 0x15a   : > { %v1902_v1 = vmax.f32 %v1039_v62, 0.0 }
 0x15b   : > { %v1904_v2 = vmax.f32 %v1038_v63, 0.0  ;;  %v1026_v3 = vpop.f32.mrf.mxu2 }
 0x15c   : > { %v1031_v7 = vadd.f32 %v1026_v3, %v938_v0  ;;  %1131 = vmatmul.f32.vlgmr.msrb.gmra.mxu0 %v1902_v1 }
 0x15d   : > { %1111 = vmatmul.f32.vlgmr.msra.gmra.mxu3 %v1904_v2  ;;  %1218 = vmatmul.f32.vlgmr.msrb.gmra.mxu2 %v1904_v2 }
 0x15e   : > { %v1040_v12 = vadd.f32 %v1036_v33, %v1031_v7  ;;  %1621 = vmatpush.msk.msra.mxu3 %vm1091_vm10, %v1305_v4  ;;  %1436 = vmatpush.msrb.mxu0 %v1401_v5  ;;  %v1387_v33 = vld [vmem:[#allocation2 + $0x490] sm:$0xff] }
 0x15f   : > { %1623 = vmatpush.msk.msrb.mxu2 %vm1091_vm10, %v1412_v8 }
 0x160   : > { %v1911_v16 = vmax.f32 %v1040_v12, 0.0  ;;  %1355 = vmatpush.msra.mxu3 %v1304_v9  ;;  %1437 = vmatpush.msrb.mxu0 %v1400_v11 }
 0x161   : > { %1462 = vmatpush.msrb.mxu2 %v1411_v13 }
 0x162   : > { %1356 = vmatpush.msra.mxu3 %v1303_v14  ;;  %1438 = vmatpush.msrb.mxu0 %v1399_v15 }
 0x163   : > { %1463 = vmatpush.msrb.mxu2 %v1410_v17  ;;  %1618 = vmatmul.msk.f32.vlgmr.msrb.gmra.mxu1 %vm1087_vm11, %v1911_v16 }
 0x164   : > { %1357 = vmatpush.msra.mxu3 %v1302_v18  ;;  %1416 = vmatpush.msrb.mxu1 %v1385_v19 }
 0x165   : > { %1439 = vmatpush.msrb.mxu0 %v1398_v20  ;;  %1464 = vmatpush.msrb.mxu2 %v1409_v21 }
 0x166   : > { %1620 = vmatmul.msk.f32.vlgmr.msrb.gmra.mxu3 %vm1087_vm11, %v1911_v16  ;;  %1325 = vmatmul.f32.vlgmr.msra.gmra.mxu0 %v1904_v2 }
 0x167   : > { %1345 = vmatmul.f32.vlgmr.msra.gmra.mxu2 %v1902_v1  ;;  %1358 = vmatpush.msra.mxu3 %v1301_v22 }
 0x168   : > { %1417 = vmatpush.msrb.mxu1 %v1384_v23  ;;  %1440 = vmatpush.msrb.mxu0 %v1397_v25 }
 0x169   : > { %1465 = vmatpush.msrb.mxu2 %v1408_v26  ;;  %1359 = vmatpush.msra.mxu3 %v1300_v27 }
 0x16a   : > { %1418 = vmatpush.msrb.mxu1 %v1383_v29  ;;  %1441 = vmatpush.msrb.mxu0 %v1396_v30 }
 0x16b   : > { %1466 = vmatpush.msrb.mxu2 %v1407_v31  ;;  %1360 = vmatpush.msra.mxu3 %v1299_v32 }
 0x16c   : > { %1419 = vmatpush.msrb.mxu1 %v1382_v34  ;;  %1442 = vmatpush.msrb.mxu0 %v1395_v35 }
 0x16d   : > { %1467 = vmatpush.msrb.mxu2 %v1406_v36  ;;  %1238 = vmatmul.f32.vlgmr.msra.gmra.mxu1 %v1902_v1 }
 0x16e   : > { %1361 = vmatpush.msra.mxu3 %v1298_v37  ;;  %1420 = vmatpush.msrb.mxu1 %v1381_v38 }
 0x16f   : > { %1443 = vmatpush.msrb.mxu0 %v1394_v39  ;;  %1468 = vmatpush.msrb.mxu2 %v1405_v40 }
 0x170   : > { %1362 = vmatpush.msra.mxu3 %v1297_v41  ;;  %1421 = vmatpush.msrb.mxu1 %v1380_v6 }
 0x171   : > { %1444 = vmatpush.msrb.mxu0 %v1393_v24  ;;  %1469 = vmatpush.msrb.mxu2 %v1404_v42 }
 0x172   : > { %1363 = vmatpush.msra.mxu3 %v1296_v44  ;;  %1422 = vmatpush.msrb.mxu1 %v1379_v45 }
 0x173   : > { %1445 = vmatpush.msrb.mxu0 %v1392_v46  ;;  %1470 = vmatpush.msrb.mxu2 %v1403_v47 }
 0x174   : > { %1364 = vmatpush.msra.mxu3 %v1295_v48  ;;  %1423 = vmatpush.msrb.mxu1 %v1378_v49 }
 0x175   : > { %1446 = vmatpush.msrb.mxu0 %v1391_v10  ;;  %1471 = vmatpush.msrb.mxu2 %v1402_v43 }
 0x176   : > { %1622 = vmatmul.msk.f32.vlgmr.msra.gmra.mxu3 %vm1087_vm11, %v1911_v16  ;;  %1624 = vmatmul.msk.f32.vlgmr.msrb.gmra.mxu2 %vm1087_vm11, %v1911_v16 }
 0x177   : > { %1424 = vmatpush.msrb.mxu1 %v1377_v50  ;;  %1447 = vmatpush.msrb.mxu0 %v1390_v51 }
 0x179   : > { %1425 = vmatpush.msrb.mxu1 %v1376_v52  ;;  %1448 = vmatpush.msrb.mxu0 %v1389_v53 }
 0x17b   : > { %1426 = vmatpush.msrb.mxu1 %v1375_v54  ;;  %1449 = vmatpush.msrb.mxu0 %v1388_v55 }
 0x17d   : > { %1427 = vmatpush.msrb.mxu1 %v1374_v28  ;;  %1450 = vmatpush.msrb.mxu0 %v1387_v33 }
 0x17f   : > { %1428 = vmatpush.msrb.mxu1 %v1373_v56  ;;  %1451 = vmatpush.msrb.mxu0 %v1386_v57 }
 0x180   : > { %1452 = vmatmul.f32.vlgmr.msrb.gmra.mxu0 %v1902_v1 }
 0x181   : > { %1429 = vmatpush.msrb.mxu1 %v1372_v58 }
 0x183   : > { %1430 = vmatpush.msrb.mxu1 %v1371_v59 }
 0x185   : > { %1431 = vmatpush.msrb.mxu1 %v1370_v60 }
 0x186   : > { %1432 = vmatmul.f32.vlgmr.msrb.gmra.mxu1 %v1904_v2 }
 0x1d9   : > { %v1132_v62 = vpop.f32.mrf.mxu0 }
 0x1e0   : > { %v1112_v61 = vpop.f32.mrf.mxu3  ;;  %v1152_v63 = vpop.f32.mrf.mxu1 }
 0x1e1   : > { %v1219_v0 = vpop.f32.mrf.mxu2  ;;  %v1133_v9 = vadd.f32 %v1132_v62, %v1112_v61 }
 0x1e3   : > { %v1326_v4 = vpop.f32.mrf.mxu0  ;;  %v1153_v17 = vadd.f32 %v1152_v63, %v1133_v9 }
 0x1e9   : > { %v1259_v3 = vpop.f32.mrf.mxu3 }
 0x1ea   : > { %v1239_v5 = vpop.f32.mrf.mxu1  ;;  %v1346_v7 = vpop.f32.mrf.mxu2 }
 0x1eb   : > { %v1240_v8 = vadd.f32 %v1239_v5, %v1219_v0  ;;  %v1347_v14 = vadd.f32 %v1346_v7, %v1326_v4 }
 0x1ed   : > { %v1260_v13 = vadd.f32 %v1259_v3, %v1240_v8 }
 0x1ef   : > { %v1476_v19 = vmax.f32 %v1153_v17, %v1260_v13 }
 0x1f9   : > { %v1366_v11 = vpop.f32.mrf.mxu3  ;;  %v1473_v16 = vpop.f32.mrf.mxu2 }
 0x1fa   : > { %v1367_v2 = vadd.f32 %v1366_v11, %v1347_v14 }
 0x1fd   : > { %v1453_v1 = vpop.f32.mrf.mxu0 }
 0x203   : > { %v1433_v12 = vpop.f32.mrf.mxu1 }
 0x204   : > { %v1454_v15 = vadd.f32 %v1453_v1, %v1433_v12 }
 0x206   : > { %v1474_v18 = vadd.f32 %v1473_v16, %v1454_v15 }
 0x208   : > { %v1477_v20 = vmax.f32 %v1367_v2, %v1474_v18 }
 0x20a   : > { %v1478_v21 = vmax.f32 %v1476_v19, %v1477_v20 }
 0x20c   : > { %1480 = vst.msk [vmem:[%s212_s9] sm:$0xff] %vm1479_vm12, %v1478_v21 }
 0x20d PF: > { %s15_s15 = sadd.s32 1, %s1699_s15  }
 0x20e   : > { %p12_p7 = scmp.ge.s32.totalorder %s15_s15, 4  }
 0x210   :  { %14 = sbr.rel (!%p12_p7) target bundleno = 1 (0x1), region = 91 }
 0x215   :  { %1500 = vsyncpa [#allocation3], 1 }
 0x216   :  { %1502 = vsyncpa [#allocation3 + $0x1], 1 }

</bundles_post_ra>
